<compile_context>
chip_gen: v7x
topology: tpu7x:2x2x1
jax: 0.10.0
libtpu: 0.0.40
codegen_flags: <defaults>
</compile_context>

<pallas_src>
import functools

import jax
import jax.numpy as jnp
from jax.experimental import pallas as pl
from jax.experimental.pallas import tpu as pltpu

_LANES = 128


def _dice_kernel(x_ref, t_ref, part_ref, *, chunk, s_valid, needs_mask):
    """One (sample, spatial-tile) grid step.

    x_ref, t_ref : (1, C, s_tile, 128) blocks in VMEM, native dtype.
    part_ref     : (1, 2, 8, 128) f32 output block:
                   [0] = sum over tile of softmax(x) * t   (intersection partial)
                   [1] = sum over tile of t                (target-sum partial)
    """
    s_tile = x_ref.shape[2]
    j = pl.program_id(1)

    if needs_mask:
        # Valid sublane rows in this (possibly ragged) spatial tile.
        rows_valid = jnp.minimum(s_valid - j * s_tile, s_tile)

    def process(start, size, acc_i, acc_t):
        # Cast one sub-chunk to f32: keeps the f32 working set at
        # ~size*C*128*4 B so the DMA tile can stay multi-MB without VMEM OOM.
        x = x_ref[0, :, pl.ds(start, size), :].astype(jnp.float32)   # (C, size, 128)
        t = t_ref[0, :, pl.ds(start, size), :].astype(jnp.float32)

        # Softmax over the channel axis (axis 0): elementwise across vreg
        # planes (channel is a leading, non-tiled axis -> pure VPU).
        m = jnp.max(x, axis=0, keepdims=True)                        # (1, size, 128)
        e = jnp.exp(x - m)
        s = jnp.sum(e, axis=0, keepdims=True)
        # EUP approx reciprocal + one Newton step (~f32 accuracy, free slot).
        r = pl.reciprocal(s, approx=True)
        r = r * (2.0 - s * r)

        # Fusion: sum_c(softmax * t) == r * sum_c(e * t); softmax never built.
        prod = r[0] * jnp.sum(e * t, axis=0)                         # (size, 128)
        targ = jnp.sum(t, axis=0)                                    # (size, 128)

        if needs_mask:
            # Zero rows past the end of the spatial axis (ragged last tile;
            # OOB block rows contain unspecified data).
            row = jax.lax.broadcasted_iota(jnp.int32, (size, _LANES), 0) + start
            keep = row < rows_valid
            prod = jnp.where(keep, prod, 0.0)
            targ = jnp.where(keep, targ, 0.0)

        # Fold (size, 128) -> (8, 128) with VPU adds (no per-chunk XLU reduce).
        if size % 8 == 0:
            prod8 = prod.reshape(size // 8, 8, _LANES).sum(axis=0)
            targ8 = targ.reshape(size // 8, 8, _LANES).sum(axis=0)
        else:
            # Tiny/odd remainder (only when the whole spatial dim is tiny):
            # one cross-sublane reduce, placed in row 0 of the accumulator.
            row0 = jax.lax.broadcasted_iota(jnp.int32, (8, _LANES), 0) == 0
            prod8 = jnp.where(
                row0,
                jnp.broadcast_to(jnp.sum(prod, axis=0, keepdims=True), (8, _LANES)),
                0.0)
            targ8 = jnp.where(
                row0,
                jnp.broadcast_to(jnp.sum(targ, axis=0, keepdims=True), (8, _LANES)),
                0.0)
        return acc_i + prod8, acc_t + targ8

    acc_i = jnp.zeros((8, _LANES), jnp.float32)
    acc_t = jnp.zeros((8, _LANES), jnp.float32)

    n_full = s_tile // chunk            # static Python ints
    rem = s_tile % chunk

    if n_full > 0:
        def body(k, carry):
            ai, at = carry
            start = pl.multiple_of(k * chunk, chunk)
            return process(start, chunk, ai, at)
        acc_i, acc_t = jax.lax.fori_loop(0, n_full, body, (acc_i, acc_t))
    if rem > 0:
        acc_i, acc_t = process(n_full * chunk, rem, acc_i, acc_t)

    part_ref[0, 0, :, :] = acc_i
    part_ref[0, 1, :, :] = acc_t


def dice_loss(output, target, *, chunk_rows=256, max_rows_per_tile=None):
    """Soft dice loss with softmax over dim 1 (channel); PyTorch DiceLoss semantics.

    `output` (logits) and `target` share the (N, C, *spatial) layout and may be
    f32/bf16/f16 — they stream from HBM in their native dtype and are cast to
    f32 inside the kernel (do NOT upcast at the call site; bf16 halves HBM traffic).
    """
    N, C = output.shape[0], output.shape[1]
    HW = 1
    for d in output.shape[2:]:
        HW *= d

    x = output.reshape(N, C, HW)
    t = target.reshape(N, C, HW)
    bx = jnp.dtype(x.dtype).itemsize
    bt = jnp.dtype(t.dtype).itemsize

    # Spatial axis -> (sublane rows, 128 lanes).
    S = pl.cdiv(HW, _LANES)
    lane_pad = S * _LANES - HW
    if lane_pad:
        # Only the <=127-element lane remainder is padded (zeros: exact, since
        # padded target is 0 and the softmax sum is replaced by the constant HW).
        # TODO(synk): a fully pad-free ragged-lane path needs a 3-D (N,C,HW)
        # layout with channel on sublanes + in-kernel lane masking.
        x = jnp.pad(x, ((0, 0), (0, 0), (0, lane_pad)))
        t = jnp.pad(t, ((0, 0), (0, 0), (0, lane_pad)))
    x = x.reshape(N, C, S, _LANES)   # free reshape when HW % 128 == 0
    t = t.reshape(N, C, S, _LANES)

    # Sub-chunk rows: multiple of the packed-sublane count of the narrowest
    # input dtype (8 for f32, 16 for bf16/f16, 32 for int8/fp8).
    pack = 32 // min(bx, bt, 4)
    chunk = max(pack, (chunk_rows // pack) * pack)

    # Generation-aware VMEM budget (v7x: 64 MiB/TC, v5e/v6e: 128 MiB).
    try:
        vmem_cap = int(pltpu.get_tpu_info().vmem_capacity_bytes)
    except Exception:
        vmem_cap = 64 * 1024 * 1024                       # conservative (v7x)
    vmem_limit = min((vmem_cap * 3) // 4, 100 * 1024 * 1024)

    # Temp-aware tile budget: double-buffered native-dtype input blocks plus
    # the in-kernel f32 working set (~4 live (C, chunk, 128) f32 temporaries)
    # plus headroom for output blocks / internal scratch, all under vmem_limit.
    work_set = 4 * C * chunk * _LANES * 4
    headroom = 8 * 1024 * 1024
    inputs_budget = max(vmem_limit - work_set - headroom, 2 * 1024 * 1024)
    per_row = 2 * C * _LANES * (bx + bt)                  # 2 pipeline buffers / s-row
    s_tile_max = max(chunk, (inputs_budget // per_row) // chunk * chunk)
    if max_rows_per_tile is not None:                     # testing / tuning knob
        s_tile_max = max(chunk, (max_rows_per_tile // chunk) * chunk)

    if S <= s_tile_max:
        num_s = 1
        s_tile = S                                        # full dim -> always legal
    else:
        num_s = pl.cdiv(S, s_tile_max)
        s_tile = min(s_tile_max, pl.cdiv(pl.cdiv(S, num_s), chunk) * chunk)
        num_s = pl.cdiv(S, s_tile)                        # no fully-OOB grid step
    needs_mask = (num_s * s_tile != S)

    kernel = functools.partial(_dice_kernel, chunk=chunk, s_valid=S,
                               needs_mask=needs_mask)

    elems = N * C * HW
    cost = pl.CostEstimate(
        flops=8 * elems,
        transcendentals=elems,
        bytes_accessed=elems * (bx + bt) + N * num_s * 2 * 8 * _LANES * 4,
    )

    parts = pl.pallas_call(
        kernel,
        out_shape=jax.ShapeDtypeStruct((N * num_s, 2, 8, _LANES), jnp.float32),
        grid_spec=pltpu.PrefetchScalarGridSpec(
            num_scalar_prefetch=0,
            grid=(N, num_s),
            in_specs=[
                pl.BlockSpec((1, C, s_tile, _LANES), lambda i, j: (i, 0, j, 0)),
                pl.BlockSpec((1, C, s_tile, _LANES), lambda i, j: (i, 0, j, 0)),
            ],
            out_specs=pl.BlockSpec((1, 2, 8, _LANES),
                                   lambda i, j: (i * num_s + j, 0, 0, 0)),
        ),
        compiler_params=pltpu.CompilerParams(
            dimension_semantics=("parallel", "parallel"),
            vmem_limit_bytes=vmem_limit,
        ),
        cost_estimate=cost,
    )(x, t)

    # Tiny final reduction in XLA: (N*num_s, 2, 8, 128) f32 partials.
    parts = parts.reshape(N, num_s, 2, 8, _LANES)
    sums = jnp.sum(parts, axis=(1, 3, 4))                 # (N, 2)
    inter, sum_t = sums[:, 0], sums[:, 1]
    # sum(softmax) over (C, HW) is exactly the valid pixel count.
    dice = 2.0 * inter / (jnp.float32(HW) + sum_t + jnp.float32(1e-10))
    return 1.0 - jnp.sum(dice) / jnp.float32(N)


def _dice_loss_ref(output, target):
    # Pure-JAX reference matching the PyTorch forward exactly.
    N = output.shape[0]
    sm = jax.nn.softmax(output.astype(jnp.float32), axis=1)
    of = sm.reshape(N, -1)
    tf = target.astype(jnp.float32).reshape(N, -1)
    inter = (of * tf).sum(1)
    loss = 2 * inter / (of.sum(1) + tf.sum(1) + 1e-10)
    return 1 - loss.sum() / N


if __name__ == "__main__":
    key = jax.random.PRNGKey(0)
    k1, k2, k3, k4 = jax.random.split(key, 4)

    # Main check: small NCHW shapes matching the PyTorch module's usage.
    N, C, H, W = 2, 4, 16, 16
    logits = jax.random.normal(k1, (N, C, H, W), dtype=jnp.float32)
    labels = jax.random.randint(k2, (N, H, W), 0, C)
    target = jnp.transpose(jax.nn.one_hot(labels, C, dtype=jnp.float32), (0, 3, 1, 2))

    out = dice_loss(logits, target)
    jax.block_until_ready(out)
    ref = _dice_loss_ref(logits, target)
    assert jnp.allclose(out, ref, atol=1e-5, rtol=1e-5), (out, ref)

    # Second check: non-128-aligned spatial + forced multi-tile spatial grid
    # (exercises the lane remainder, the ragged-tile mask and the chunk loop).
    N2, C2, H2, W2 = 1, 3, 20, 70
    logits2 = jax.random.normal(k3, (N2, C2, H2, W2), dtype=jnp.float32)
    labels2 = jax.random.randint(k4, (N2, H2, W2), 0, C2)
    target2 = jnp.transpose(jax.nn.one_hot(labels2, C2, dtype=jnp.float32), (0, 3, 1, 2))

    out2 = dice_loss(logits2, target2, chunk_rows=8, max_rows_per_tile=8)
    jax.block_until_ready(out2)
    ref2 = _dice_loss_ref(logits2, target2)
    assert jnp.allclose(out2, ref2, atol=1e-5, rtol=1e-5), (out2, ref2)

    print("KERNEL_OK")
</pallas_src>

<mosaic_0001>
module attributes {stable_mosaic.version = 11 : i64} {
  func.func @_dice_kernel(%arg0: i32, %arg1: i32, %arg2: memref<1x4x2x128xf32, #tpu.memory_space<vmem>>, %arg3: memref<1x4x2x128xf32, #tpu.memory_space<vmem>>, %arg4: memref<1x2x8x128xf32, #tpu.memory_space<vmem>>) attributes {dimension_semantics = [#tpu.dimension_semantics<parallel>, #tpu.dimension_semantics<parallel>], iteration_bounds = array<i64: 2, 1>, scalar_prefetch = 0 : i64, scratch_operands = 0 : i64, tpu.core_type = #tpu.core_type<tc>, window_params = [{transform_indices = @transform_0, window_bounds = array<i64: 1, 4, 2, 128>}, {transform_indices = @transform_1, window_bounds = array<i64: 1, 4, 2, 128>}, {transform_indices = @transform_2, window_bounds = array<i64: 1, 2, 8, 128>}]} {
    %cst = arith.constant 0.000000e+00 : f32
    %0 = vector.broadcast %cst : f32 to vector<8x128xf32>
    %cst_0 = arith.constant 0.000000e+00 : f32
    %1 = vector.broadcast %cst_0 : f32 to vector<8x128xf32>
    %c0 = arith.constant 0 : index
    %c0_1 = arith.constant 0 : index
    %c0_2 = arith.constant 0 : index
    %c0_3 = arith.constant 0 : index
    %2 = vector.load %arg2[%c0, %c0_1, %c0_2, %c0_3] : memref<1x4x2x128xf32, #tpu.memory_space<vmem>>, vector<1x4x2x128xf32>
    %3 = vector.shape_cast %2 : vector<1x4x2x128xf32> to vector<4x2x128xf32>
    %c0_4 = arith.constant 0 : index
    %c0_5 = arith.constant 0 : index
    %c0_6 = arith.constant 0 : index
    %c0_7 = arith.constant 0 : index
    %4 = vector.load %arg3[%c0_4, %c0_5, %c0_6, %c0_7] : memref<1x4x2x128xf32, #tpu.memory_space<vmem>>, vector<1x4x2x128xf32>
    %5 = vector.shape_cast %4 : vector<1x4x2x128xf32> to vector<4x2x128xf32>
    %cst_8 = arith.constant dense<0xFF800000> : vector<2x128xf32>
    %6 = vector.multi_reduction <maximumf>, %3, %cst_8 [0] : vector<4x2x128xf32> to vector<2x128xf32>
    %7 = vector.shape_cast %6 : vector<2x128xf32> to vector<1x2x128xf32>
    %8 = vector.broadcast %7 : vector<1x2x128xf32> to vector<4x2x128xf32>
    %9 = arith.subf %3, %8 : vector<4x2x128xf32>
    %10 = math.exp %9 : vector<4x2x128xf32>
    %cst_9 = arith.constant dense<0.000000e+00> : vector<2x128xf32>
    %11 = vector.multi_reduction <add>, %10, %cst_9 [0] : vector<4x2x128xf32> to vector<2x128xf32>
    %12 = vector.shape_cast %11 : vector<2x128xf32> to vector<1x2x128xf32>
    %13 = tpu.reciprocal %12 {approx = true} : vector<1x2x128xf32> -> vector<1x2x128xf32>
    %14 = arith.mulf %12, %13 : vector<1x2x128xf32>
    %cst_10 = arith.constant 2.000000e+00 : f32
    %15 = vector.broadcast %cst_10 : f32 to vector<1x2x128xf32>
    %16 = arith.subf %15, %14 : vector<1x2x128xf32>
    %17 = arith.mulf %13, %16 : vector<1x2x128xf32>
    %18 = vector.shape_cast %17 : vector<1x2x128xf32> to vector<2x128xf32>
    %19 = arith.mulf %10, %5 : vector<4x2x128xf32>
    %cst_11 = arith.constant dense<0.000000e+00> : vector<2x128xf32>
    %20 = vector.multi_reduction <add>, %19, %cst_11 [0] : vector<4x2x128xf32> to vector<2x128xf32>
    %21 = arith.mulf %18, %20 : vector<2x128xf32>
    %cst_12 = arith.constant dense<0.000000e+00> : vector<2x128xf32>
    %22 = vector.multi_reduction <add>, %5, %cst_12 [0] : vector<4x2x128xf32> to vector<2x128xf32>
    %23 = tpu.iota {dimensions = array<i32: 0>} : vector<8x128xi32>
    %c0_i32 = arith.constant 0 : i32
    %24 = vector.broadcast %c0_i32 : i32 to vector<8x128xi32>
    %25 = arith.cmpi eq, %23, %24 : vector<8x128xi32>
    %cst_13 = arith.constant dense<0.000000e+00> : vector<128xf32>
    %26 = vector.multi_reduction <add>, %21, %cst_13 [0] : vector<2x128xf32> to vector<128xf32>
    %27 = vector.shape_cast %26 : vector<128xf32> to vector<1x128xf32>
    %28 = vector.shape_cast %27 : vector<1x128xf32> to vector<1x128xf32>
    %29 = vector.broadcast %28 : vector<1x128xf32> to vector<8x128xf32>
    %cst_14 = arith.constant 0.000000e+00 : f32
    %30 = vector.broadcast %cst_14 : f32 to vector<8x128xf32>
    %31 = arith.select %25, %29, %30 : vector<8x128xi1>, vector<8x128xf32>
    %cst_15 = arith.constant dense<0.000000e+00> : vector<128xf32>
    %32 = vector.multi_reduction <add>, %22, %cst_15 [0] : vector<2x128xf32> to vector<128xf32>
    %33 = vector.shape_cast %32 : vector<128xf32> to vector<1x128xf32>
    %34 = vector.shape_cast %33 : vector<1x128xf32> to vector<1x128xf32>
    %35 = vector.broadcast %34 : vector<1x128xf32> to vector<8x128xf32>
    %cst_16 = arith.constant 0.000000e+00 : f32
    %36 = vector.broadcast %cst_16 : f32 to vector<8x128xf32>
    %37 = arith.select %25, %35, %36 : vector<8x128xi1>, vector<8x128xf32>
    %38 = arith.addf %0, %31 : vector<8x128xf32>
    %39 = arith.addf %1, %37 : vector<8x128xf32>
    %c0_17 = arith.constant 0 : index
    %c0_18 = arith.constant 0 : index
    %c0_19 = arith.constant 0 : index
    %c0_20 = arith.constant 0 : index
    %40 = vector.load %arg4[%c0_17, %c0_18, %c0_19, %c0_20] : memref<1x2x8x128xf32, #tpu.memory_space<vmem>>, vector<1x1x8x128xf32>
    %41 = vector.shape_cast %40 : vector<1x1x8x128xf32> to vector<8x128xf32>
    %42 = vector.shape_cast %38 : vector<8x128xf32> to vector<1x1x8x128xf32>
    tpu.vector_store %arg4[%c0_17, %c0_18, %c0_19, %c0_20], %42 {strides = array<i32>} : memref<1x2x8x128xf32, #tpu.memory_space<vmem>>, vector<1x1x8x128xf32>,
    %c0_21 = arith.constant 0 : index
    %c1 = arith.constant 1 : index
    %c0_22 = arith.constant 0 : index
    %c0_23 = arith.constant 0 : index
    %43 = vector.load %arg4[%c0_21, %c1, %c0_22, %c0_23] : memref<1x2x8x128xf32, #tpu.memory_space<vmem>>, vector<1x1x8x128xf32>
    %44 = vector.shape_cast %43 : vector<1x1x8x128xf32> to vector<8x128xf32>
    %45 = vector.shape_cast %39 : vector<8x128xf32> to vector<1x1x8x128xf32>
    tpu.vector_store %arg4[%c0_21, %c1, %c0_22, %c0_23], %45 {strides = array<i32>} : memref<1x2x8x128xf32, #tpu.memory_space<vmem>>, vector<1x1x8x128xf32>,
    return
  }
  func.func @transform_0(%arg0: i32, %arg1: i32) -> (i32, i32, i32, i32) {
    %c0_i32 = arith.constant 0 : i32
    %c0_i32_0 = arith.constant 0 : i32
    %c0_i32_1 = arith.constant 0 : i32
    return %arg0, %c0_i32, %arg1, %c0_i32_0 : i32, i32, i32, i32
  }
  func.func @transform_1(%arg0: i32, %arg1: i32) -> (i32, i32, i32, i32) {
    %c0_i32 = arith.constant 0 : i32
    %c0_i32_0 = arith.constant 0 : i32
    %c0_i32_1 = arith.constant 0 : i32
    return %arg0, %c0_i32, %arg1, %c0_i32_0 : i32, i32, i32, i32
  }
  func.func @transform_2(%arg0: i32, %arg1: i32) -> (i32, i32, i32, i32) {
    %c1_i32 = arith.constant 1 : i32
    %0 = arith.muli %arg0, %c1_i32 : i32
    %1 = arith.addi %0, %arg1 : i32
    %c0_i32 = arith.constant 0 : i32
    %c0_i32_0 = arith.constant 0 : i32
    %c0_i32_1 = arith.constant 0 : i32
    %c0_i32_2 = arith.constant 0 : i32
    return %1, %c0_i32, %c0_i32_0, %c0_i32_1 : i32, i32, i32, i32
  }
}

</mosaic_0001>

<bundles_post_ra>
// kernel: tpu_custom_call.1
= control target key start
LH: loop header
LB: loop body
LE: loop exit
PB: predicated region body
PF: predicated region fallthrough
CT: control target
= control target key end

     0   :  { %7 = vsyncpa [#allocation3], 0  ;;  %s965_s0 = inlined_call_operand.hbm [shape: f32[2,4,2,128], index: 0, kind: input, shape index: {}]   ;;  %s966_s1 = inlined_call_operand.hbm [shape: f32[2,4,2,128], index: 1, kind: input, shape index: {}]   ;;  %s967_s2 = inlined_call_operand.hbm [shape: f32[2,2,8,128], index: 2, kind: output, shape index: {}]  }
   0x1   :  { %9 = vsyncpa [#allocation3 + $0x1], 0 }
   0x2   :  { %10 = vsyncpa [#allocation6], 0 }
   0x3   :  { %12 = vsyncpa [#allocation6 + $0x1], 0 }
   0x4   :  { %13 = vsyncpa [#allocation4], 0 }
   0x5   :  { %15 = vsyncpa [#allocation4 + $0x1], 0  ;;  %s703_s9 = smov 0   ;;  %s705_s10 = smov 0  }
   0x6   :  { %s707_s11 = smov 0   ;;  %s709_s12 = smov 0  }
   0x7   :  { %s711_s13 = smov 0   ;;  %s713_s14 = smov 0  }
   0x8 LB: > { %s429_s15 = sadd.s32 4294967295, %s679_s14   ;;  %s430_s16 = sadd.s32 4294967294, %s679_s14   ;;  %s679_s14 = sphi %s713_s14, %s21_s14   ;;  %s675_s13 = sphi %s711_s13, %s985_s13   ;;  %s671_s12 = sphi %s709_s12, %s984_s12   ;;  %s667_s11 = sphi %s707_s11, %s983_s11   ;;  %s663_s10 = sphi %s705_s10, %s982_s10   ;;  %s659_s9 = sphi %s703_s9, %s981_s9  }
   0x9   : > { %s33_s17 = sadd.s32 1, %s675_s13  ;;  %s42_s18 = sadd.s32 1, %s667_s11 }
   0xa   : > { %p35_p0 = scmp.ge.s32.totalorder %s33_s17, 2  ;;  %p49_p1 = scmp.ne.s32.totalorder %s667_s11, %s663_s10 }
   0xb   : > { %p50_p2 = scmp.eq.s32.totalorder %s679_s14, 0  ;;  %p55_p3 = scmp.ne.s32.totalorder %s663_s10, %s659_s9 }
   0xc   : > { %s987_s17 = smov (%p35_p0, %s33_s17), 0  ;;  %p56_p5 = scmp.eq.s32.totalorder %s429_s15, 0 }
   0xd   : > { %p744_p4 = por %p50_p2, %p49_p1  ;;  %s37_s20 = ssub.s32 %s675_s13, %s987_s17 }
   0xe   : > { %p109_p6 = scmp.eq.s32.totalorder %s429_s15, 1  ;;  %p40_p7 = scmp.eq.s32.totalorder %s37_s20, 0 }
   0xf   : > { %p750_p8 = por %p56_p5, %p55_p3  ;;  %p115_p10 = scmp.eq.s32.totalorder %s430_s16, 1 }
  0x10   : > { %p754_p9 = por %p109_p6, %p49_p1  ;;  %p469_p13 = scmp.lt.s32.totalorder %s679_s14, 2 }
  0x11   : > { %s971_s21 = scalar_select %p750_p8, 1, 0 }
  0x12   : > { %s972_s22 = scalar_select %p754_p9, 1, 0 }
  0x13   : > { %s759_s23 = scalar_select %p40_p7, %s667_s11, %s42_s18  }
  0x14   : > { %p761_p11 = por %p115_p10, %p55_p3  ;;  %s768_s25 = sand.u32 1, %s667_s11  }
  0x15   : > { %s433_s26 = sshll.u32 %s768_s25, 3  ;;  %s449_s27 = sshll.u32 %s675_s13, 7 }
  0x16   : > { %s973_s24 = scalar_select %p761_p11, 1, 0 }
  0x17   : > { %s777_s30 = scalar_lea.hbm %s965_s0, %s449_s27  ;;  %s139_s3 = scalar_lea.vmem [#allocation2], %s433_s26 }
  0x18   : > { %s147_s4 = sshll.u32 %s139_s3, 4  ;;  %p785_p0 = pnand %p469_p13, %p744_p4  ;;  %s781_s4 = int_to_ptr.vmem [resolvable:$true] %s147_s4 }
  0x19   : > { %s136_s6 = scalar_lea.sflag [#allocation3], %s768_s25  ;;  %s533_s7 = scalar_lea.hbm %s777_s30, 128 }
  0x1a   : > { %p534_p2 = scmp.ne.s32.totalorder %s777_s30, %s533_s7  ;;  %p535_p3 = pneg %p785_p0 }
  0x1b   : > { %s538_s16 = scalar_lea.hbm %s965_s0, 256  ;;  %p539_p4 = scmp.lt.u32.totalorder %s777_s30, %s965_s0 }
  0x1c   : > { %p536_p5 = pnand %p535_p3, %p534_p2  ;;  %p540_p7 = scmp.lt.u32.totalorder %s538_s16, %s533_s7 }
  0x1d   : > { %p542_p13 = scmp.lt.u32.totalorder %s533_s7, %s777_s30 }
  0x1e   : > { %p537_p6 = pneg %p536_p5  ;;  %p541_p10 = por %p540_p7, %p539_p4 }
  0x20   : > { %p543_p12 = por %p542_p13, %p541_p10 }
  0x22   : > { %p544_p1 = pnand %p543_p12, %p537_p6 }
  0x24   : > { %547 = shalt.err (!%p544_p1)
}
  0x25   : > { %s548_s20 = scalar_lea.vmem %s781_s4, 128  ;;  %s681_s28 = smov [#allocation2]  }
  0x26   : > { %p549_p2 = scmp.ne.s32.totalorder %s781_s4, %s548_s20  ;;  %s553_s29 = sshll.u32 %s681_s28, 4  ;;  %s554_s29 = int_to_ptr.vmem [resolvable:$false] %s553_s29 }
  0x27   : > { %s555_s3 = scalar_lea.vmem %s554_s29, 256  ;;  %p556_p9 = scmp.lt.s32.totalorder %s781_s4, %s554_s29 }
  0x28   : > { %p551_p5 = pnand %p549_p2, %p535_p3  ;;  %p557_p4 = scmp.lt.s32.totalorder %s555_s3, %s548_s20 }
  0x2a   : > { %p552_p11 = pneg %p551_p5  ;;  %p558_p7 = por %p557_p4, %p556_p9 }
  0x2c   : > { %p559_p10 = pnand %p558_p7, %p552_p11 }
  0x2e   : > { %562 = shalt.err (!%p559_p10)
}
  0x2f   : > { %s682_s7 = smov 32   ;;  %s683_s8 = smov 2  }
  0x30   : > { %461 = dma.hbm_to_vmem [thread:$0]  (!%p785_p0), %s777_s30, 128, %s781_s4, %s136_s6, %s682_s7, %s682_s7, %s683_s8  }
  0x31   : > { %p177_p9 = scmp.lt.s32.totalorder %s679_s14, 3  ;;  %s827_s18 = scalar_lea.hbm %s966_s1, %s449_s27 }
  0x32   : > { %p975_p11 = scmp.ge.s32.totalorder %s679_s14, 1  ;;  %s161_s20 = scalar_lea.vmem [#allocation5], %s433_s26 }
  0x33   : > { %s169_s28 = sshll.u32 %s161_s20, 4  ;;  %s158_s30 = scalar_lea.sflag [#allocation6], %s768_s25  ;;  %s837_s28 = int_to_ptr.vmem [resolvable:$true] %s169_s28 }
  0x34   : > { %p831_p12 = pnand %p975_p11, %p177_p9  ;;  %s563_s4 = scalar_lea.hbm %s827_s18, 128 }
  0x35   : > { %p564_p1 = scmp.ne.s32.totalorder %s827_s18, %s563_s4  ;;  %s568_s29 = scalar_lea.hbm %s966_s1, 256 }
  0x36   : > { %p569_p2 = scmp.lt.u32.totalorder %s827_s18, %s966_s1  ;;  %p570_p5 = scmp.lt.u32.totalorder %s568_s29, %s563_s4 }
  0x37   : > { %p566_p6 = pnand %p564_p1, %p535_p3  ;;  %p572_p7 = scmp.lt.u32.totalorder %s563_s4, %s827_s18 }
  0x38   : > { %p571_p4 = por %p570_p5, %p569_p2 }
  0x39   : > { %p567_p13 = pneg %p566_p6 }
  0x3a   : > { %p573_p10 = por %p572_p7, %p571_p4 }
  0x3c   : > { %p574_p9 = pnand %p573_p10, %p567_p13 }
  0x3e   : > { %577 = shalt.err (!%p574_p9)
}
  0x3f   : > { %s578_s26 = scalar_lea.vmem %s837_s28, 128  ;;  %s684_s16 = smov [#allocation5]  }
  0x40   : > { %p579_p11 = scmp.ne.s32.totalorder %s837_s28, %s578_s26  ;;  %s583_s20 = sshll.u32 %s684_s16, 4  ;;  %s584_s20 = int_to_ptr.vmem [resolvable:$false] %s583_s20 }
  0x41   : > { %s585_s27 = scalar_lea.vmem %s584_s20, 256  ;;  %p586_p8 = scmp.lt.s32.totalorder %s837_s28, %s584_s20 }
  0x42   : > { %p581_p1 = pnand %p579_p11, %p535_p3  ;;  %p587_p2 = scmp.lt.s32.totalorder %s585_s27, %s578_s26 }
  0x44   : > { %p582_p6 = pneg %p581_p1  ;;  %p588_p5 = por %p587_p2, %p586_p8 }
  0x46   : > { %p589_p4 = pnand %p588_p5, %p582_p6 }
  0x48   : > { %592 = shalt.err (!%p589_p4)
}
  0x49   : > { %464 = dma.hbm_to_vmem [thread:$0]  (!%p785_p0), %s827_s18, 128, %s837_s28, %s158_s30, %s682_s7, %s682_s7, %s683_s8  }
  0x4a   : > { %181 = sbr.rel (%p831_p12) target bundleno = 163 (0xa3), region = 28  ;;  %s871_s4 = sand.u32 (!%p831_p12), 1, %s663_s10  }
  0x4b   : > { %s440_s6 = sshll.u32 (!%p831_p12), %s871_s4, 3  ;;  %s184_s29 = scalar_lea.sflag (!%p831_p12), [#allocation3], %s871_s4 }
  0x4c   : > { %s187_s5 = scalar_lea.vmem (!%p831_p12), [#allocation2], %s440_s6  ;;  %p977_p8 = scmp.ne.s32.totalorder (!%p831_p12), %s971_s21, 0 }
  0x51   : > { %646 = dma.done.wait (%p977_p8), %s184_s29, 128  }
  0x52   : > { %648 = vsyncadd (%p977_p8), %s184_s29, 4294967168  ;;  %s193_s25 = scalar_lea.sflag [#allocation6], %s871_s4  ;;  %s196_s7 = scalar_lea.vmem [#allocation5], %s440_s6 }
  0x53   : > { %650 = dma.done.wait (%p977_p8), %s193_s25, 128  }
  0x54   : > { %652 = vsyncadd (%p977_p8), %s193_s25, 4294967168  ;;  %vm231_vm0 = vcmask 1041408   ;;  %v223_v0 = vld [vmem:[%s187_s5] sm:$0x3]  ;;  %v224_v1 = vld [vmem:[%s187_s5 + $0x2] sm:$0x3]  ;;  %v281_v32 = vlaneseq }
  0x55   : > { %v225_v2 = vld [vmem:[%s187_s5 + $0x4] sm:$0x3]  ;;  %v226_v3 = vld [vmem:[%s187_s5 + $0x6] sm:$0x3]  ;;  %v227_v4 = vld [vmem:[%s196_s7] sm:$0x3] }
  0x56   : > { %v228_v5 = vld [vmem:[%s196_s7 + $0x2] sm:$0x3]  ;;  %v232_v6 = vsel %vm231_vm0, %v223_v0, -inf  ;;  %v233_v7 = vsel %vm231_vm0, %v224_v1, -inf  ;;  %v229_v8 = vld [vmem:[%s196_s7 + $0x4] sm:$0x3] }
  0x57   : > { %v234_v9 = vsel %vm231_vm0, %v225_v2, -inf  ;;  %v235_v10 = vsel %vm231_vm0, %v226_v3, -inf  ;;  %v236_v11 = vmax.f32 %v232_v6, %v233_v7  ;;  %v274_v12 = vsel %vm231_vm0, %v227_v4, 0.0  ;;  %v230_v16 = vld [vmem:[%s196_s7 + $0x6] sm:$0x3]  ;;  %s442_s21 = sshll.u32 %s871_s4, 4 }
  0x58   : > { %v237_v13 = vmax.f32 %v234_v9, %v235_v10  ;;  %v275_v14 = vsel %vm231_vm0, %v228_v5, 0.0  ;;  %v277_v15 = vsel %vm231_vm0, %v229_v8, 0.0  ;;  %v279_v19 = vsel %vm231_vm0, %v230_v16, 0.0  ;;  %s898_s8 = scalar_lea.vmem [#allocation7], %s442_s21  ;;  %s451_s19 = sshll.u32 %s671_s12, 8 }
  0x59   : > { %v276_v17 = vadd.f32 %v275_v14, %v274_v12  ;;  %v282_v35 = vshrl.u32 %v281_v32, 7  ;;  %s320_s18 = sshll.u32 %s898_s8, 4  ;;  %s914_s3 = scalar_lea.hbm %s967_s2, %s451_s19  ;;  %s909_s18 = int_to_ptr.vmem [resolvable:$true] %s320_s18 }
  0x5a   : > { %v238_v18 = vmax.f32 %v236_v11, %v237_v13  ;;  %s306_s15 = scalar_lea.sflag [#allocation4], %s871_s4  ;;  %s593_s26 = scalar_lea.vmem %s909_s18, 256 }
  0x5b   : > { %v278_v20 = vadd.f32 %v277_v15, %v276_v17  ;;  %vm283_vm1 = vcmp.eq.s32.totalorder %v282_v35, 0  ;;  %p594_p0 = scmp.ne.s32.totalorder %s909_s18, %s593_s26  ;;  %p978_p3 = scmp.ne.s32.totalorder %s972_s22, 0 }
  0x5c   : > { %v239_v21 = vsub.f32 %v223_v0, %v238_v18  ;;  %v240_v22 = vsub.f32 %v224_v1, %v238_v18  ;;  %v241_v23 = vsub.f32 %v225_v2, %v238_v18  ;;  %v242_v24 = vsub.f32 %v226_v3, %v238_v18  ;;  %s685_s12 = smov [#allocation7]  }
  0x5d   : > { %v280_v25 = vadd.f32 %v279_v19, %v278_v20  ;;  %p595_p12 = pnand %p594_p0, %p978_p3  ;;  %s597_s16 = sshll.u32 %s685_s12, 4  ;;  %s598_s16 = int_to_ptr.vmem [resolvable:$false] %s597_s16 }
  0x5e   : > { %v243_v26 = vmul.f32 1.442695, %v239_v21  ;;  %v245_v27 = vmul.f32 1.442695, %v240_v22  ;;  %v247_v28 = vmul.f32 1.442695, %v241_v23  ;;  %p600_p7 = scmp.lt.s32.totalorder %s909_s18, %s598_s16 }
  0x5f   : > { %v249_v29 = vmul.f32 1.442695, %v242_v24  ;;  %v292_v30 = vsel %vm231_vm0, %v280_v25, 0.0  ;;  %p596_p13 = pneg %p595_p12  ;;  %s599_s20 = scalar_lea.vmem %s598_s16, 512 }
  0x60   : > { %523 = vpow2.f32 %v243_v26  ;;  %v293_v31 = vrot.slane %v292_v30, 4  ;;  %p601_p10 = scmp.lt.s32.totalorder %s599_s20, %s593_s26 }
  0x61   : > { %525 = vpow2.f32 %v245_v27 }
  0x62   : > { %527 = vpow2.f32 %v247_v28  ;;  %v294_v33 = vadd.f32 %v293_v31, %v292_v30  ;;  %p602_p9 = por %p601_p10, %p600_p7 }
  0x63   : > { %529 = vpow2.f32 %v249_v29 }
  0x64   : > { %v295_v34 = vrot.slane %v294_v33, 2  ;;  %p603_p11 = pnand %p602_p9, %p596_p13 }
  0x66   : > { %v296_v36 = vadd.f32 %v295_v34, %v294_v33 }
  0x68   : > { %v297_v37 = vrot.slane %v296_v36, 1 }
  0x6a   : > { %v524_v38 = vpop.eup %523  ;;  %v298_v39 = vadd.f32 %v297_v37, %v296_v36 }
  0x6b   : > { %v526_v40 = vpop.eup %525  ;;  %v251_v41 = vsel %vm231_vm0, %v524_v38, 0.0  ;;  %v262_v51 = vmul.f32 %v524_v38, %v227_v4 }
  0x6c   : > { %v528_v42 = vpop.eup %527  ;;  %v252_v43 = vsel %vm231_vm0, %v526_v40, 0.0  ;;  %v299_v44 = vsel %vm283_vm1, %v298_v39, 0.0  ;;  %v263_v52 = vmul.f32 %v526_v40, %v228_v5 }
  0x6d   : > { %v530_v45 = vpop.eup %529  ;;  %v253_v46 = vadd.f32 %v252_v43, %v251_v41  ;;  %v254_v47 = vsel %vm231_vm0, %v528_v42, 0.0  ;;  %443 = vst [vmem:[%s898_s8 + $0x8] sm:$0xff] %v299_v44  ;;  %v264_v53 = vmul.f32 %v528_v42, %v229_v8  ;;  %v266_v54 = vsel %vm231_vm0, %v262_v51, 0.0 }
  0x6e   : > { %v256_v48 = vsel %vm231_vm0, %v530_v45, 0.0  ;;  %v267_v55 = vsel %vm231_vm0, %v263_v52, 0.0  ;;  %v265_v57 = vmul.f32 %v530_v45, %v230_v16 }
  0x6f   : > { %v255_v49 = vadd.f32 %v254_v47, %v253_v46  ;;  %v268_v56 = vadd.f32 %v267_v55, %v266_v54  ;;  %v269_v58 = vsel %vm231_vm0, %v264_v53, 0.0 }
  0x70   : > { %v271_v61 = vsel %vm231_vm0, %v265_v57, 0.0 }
  0x71   : > { %v257_v50 = vadd.f32 %v256_v48, %v255_v49  ;;  %v270_v59 = vadd.f32 %v269_v58, %v268_v56 }
  0x73   : > { %531 = vrcp.f32 %v257_v50  ;;  %v272_v0 = vadd.f32 %v271_v61, %v270_v59 }
  0x7d   : > { %v532_v60 = vpop.eup %531 }
  0x7e   : > { %v259_v62 = vmul.f32 %v532_v60, %v257_v50 }
  0x80   : > { %v260_v63 = vsub.f32 2.0, %v259_v62 }
  0x82   : > { %v261_v1 = vmul.f32 %v532_v60, %v260_v63 }
  0x84   : > { %v273_v2 = vmul.f32 %v272_v0, %v261_v1 }
  0x86   : > { %v284_v3 = vsel %vm231_vm0, %v273_v2, 0.0 }
  0x87   : > { %v285_v4 = vrot.slane %v284_v3, 4 }
  0x89   : > { %v286_v5 = vadd.f32 %v285_v4, %v284_v3 }
  0x8b   : > { %v287_v6 = vrot.slane %v286_v5, 2 }
  0x8d   : > { %v288_v7 = vadd.f32 %v287_v6, %v286_v5 }
  0x8f   : > { %v289_v8 = vrot.slane %v288_v7, 1 }
  0x91   : > { %v290_v9 = vadd.f32 %v289_v8, %v288_v7 }
  0x93   : > { %v291_v10 = vsel %vm283_vm1, %v290_v9, 0.0 }
  0x94   : > { %302 = vst [vmem:[%s898_s8] sm:$0xff] %v291_v10 }
  0x95   : > { %606 = shalt.err (!%p603_p11)
}
  0x96   : > { %s607_s27 = scalar_lea.hbm %s914_s3, 256  ;;  %s611_s5 = scalar_lea.hbm %s967_s2, 512 }
  0x97   : > { %p608_p1 = scmp.ne.s32.totalorder %s914_s3, %s607_s27  ;;  %p612_p5 = scmp.lt.u32.totalorder %s914_s3, %s967_s2 }
  0x98   : > { %p613_p4 = scmp.lt.u32.totalorder %s611_s5, %s607_s27  ;;  %p615_p0 = scmp.lt.u32.totalorder %s607_s27, %s914_s3 }
  0x99   : > { %p609_p6 = pnand %p608_p1, %p978_p3 }
  0x9a   : > { %p614_p8 = por %p613_p4, %p612_p5 }
  0x9b   : > { %p610_p2 = pneg %p609_p6 }
  0x9c   : > { %p616_p12 = por %p615_p0, %p614_p8 }
  0x9e   : > { %p617_p13 = pnand %p616_p12, %p610_p2 }
  0xa0   : > { %620 = shalt.err (!%p617_p13)
}
  0xa1   : > { %s686_s21 = smov 128   ;;  %s687_s8 = smov 8  }
  0xa2   : > { %456 = dma.vmem_to_hbm [thread:$0]  (%p978_p3), %s909_s18, 256, %s914_s3, %s306_s15, %s686_s21, %s686_s21, %s687_s8  }
  0xa3 PF: > { %s335_s19 = sand.u32 1, %s659_s9   ;;  %p979_p7 = scmp.ne.s32.totalorder %s973_s24, 0 }
  0xa4   : > { %p980_p10 = scmp.ge.s32.totalorder %s679_s14, 2  ;;  %s336_s28 = scalar_lea.sflag [#allocation4], %s335_s19 }
  0xa6   : > { %p466_p9 = pnand %p980_p10, %p979_p7 }
  0xa8   : > { %654 = dma.done.wait (!%p466_p9), %s336_s28, 256  }
  0xa9   : > { %656 = vsyncadd (!%p466_p9), %s336_s28, 4294967040  ;;  %s21_s14 = sadd.s32 1, %s679_s14   ;;  %s981_s9 = smov %s663_s10 }
  0xaa   : > { %p18_p11 = scmp.ge.s32.totalorder %s21_s14, 4   ;;  %s982_s10 = smov %s667_s11 }
  0xab   : > { %s983_s11 = smov %s759_s23  ;;  %s984_s12 = smov %s675_s13 }
  0xac   : > { %s985_s13 = smov %s987_s17  ;;  %20 = sbr.rel (!%p18_p11) target bundleno = 8 (0x8), region = 87 }
  0xb3   :  { %341 = vsyncpa [#allocation3], 1 }
  0xb4   :  { %343 = vsyncpa [#allocation3 + $0x1], 1 }
  0xb5   :  { %344 = vsyncpa [#allocation6], 1 }
  0xb6   :  { %346 = vsyncpa [#allocation6 + $0x1], 1 }
  0xb7   :  { %347 = vsyncpa [#allocation4], 1 }
  0xb8   :  { %349 = vsyncpa [#allocation4 + $0x1], 1 }

</bundles_post_ra>
